<compile_context>
chip_gen: v7x
topology: tpu7x:2x2x1
jax: 0.10.0
libtpu: 0.0.40
codegen_flags: <defaults>
</compile_context>

<pallas_src>
import functools
import math

import jax
import jax.numpy as jnp
from jax.experimental import pallas as pl
from jax.experimental.pallas import tpu as pltpu

BN_EPS = 1e-5
TM_MAX, TN_MAX = 512, 512                      # tile caps (exact divisors of padded dims)
VMEM_LIMIT = 32 * 1024 * 1024                  # worst-case tile set ~20 MiB -> safe everywhere


def _round_up(x, m):
    return (x + m - 1) // m * m


def _pick_tile_m(M):
    """Return (tm, Mp) with tm | Mp, tm multiple of 8, minimal row padding."""
    Mp8 = _round_up(M, 8)
    if Mp8 <= TM_MAX:
        return Mp8, Mp8
    for c in (512, 256, 128):
        if c <= TM_MAX and (_round_up(M, c) - M) * 16 <= M:   # <=~6% padded rows
            return c, _round_up(M, c)
    return 128, _round_up(M, 128)


def _pick_tile_n(Np):
    """Largest multiple of 128 <= TN_MAX that divides Np (Np itself already 128-mult)."""
    if Np <= TN_MAX:
        return Np
    for t in range(TN_MAX, 127, -128):
        if Np % t == 0:
            return t
    return Np


# -----------------------------------------------------------------------------
# Fused matmul (+ BN affine + optional residual + optional ReLU) Pallas kernel
#   * bf16 MXU operands, single full-K dot, f32 epilogue -> no accumulator RMW
# -----------------------------------------------------------------------------
def _make_mm_kernel(relu, has_res):
    def kernel(*refs):
        if has_res:
            a_ref, b_ref, s_ref, t_ref, r_ref, o_ref = refs
        else:
            a_ref, b_ref, s_ref, t_ref, o_ref = refs
            r_ref = None
        y = jnp.dot(a_ref[...], b_ref[...], preferred_element_type=jnp.float32)
        y = y * s_ref[...] + t_ref[...]
        if r_ref is not None:
            y = y + r_ref[...].astype(jnp.float32)
        if relu:
            y = jnp.maximum(y, 0.0)
        o_ref[...] = y.astype(o_ref.dtype)
    return kernel


@functools.lru_cache(maxsize=None)
def _mm_call(Mp, Kp, Np, tm, tn, relu, has_res, out_dtype_name):
    out_dtype = jnp.dtype(out_dtype_name)
    in_specs = [
        pl.BlockSpec((tm, Kp), lambda i, j: (i, 0)),   # A (bf16, full-K strip)
        pl.BlockSpec((Kp, tn), lambda i, j: (0, j)),   # B (bf16, pre-padded weights)
        pl.BlockSpec((1, tn), lambda i, j: (0, j)),    # BN scale (f32)
        pl.BlockSpec((1, tn), lambda i, j: (0, j)),    # BN bias  (f32)
    ]
    if has_res:
        in_specs.append(pl.BlockSpec((tm, tn), lambda i, j: (i, j)))  # residual (bf16)
    return pl.pallas_call(
        _make_mm_kernel(relu, has_res),
        out_shape=jax.ShapeDtypeStruct((Mp, Np), out_dtype),
        grid_spec=pltpu.PrefetchScalarGridSpec(
            num_scalar_prefetch=0,
            grid=(Mp // tm, Np // tn),
            in_specs=in_specs,
            out_specs=pl.BlockSpec((tm, tn), lambda i, j: (i, j))),
        compiler_params=pltpu.CompilerParams(
            dimension_semantics=("parallel", "parallel"),
            vmem_limit_bytes=VMEM_LIMIT),
    )


def _matmul_bn_act(a, wm, scale, bias, n_valid, residual=None, relu=True,
                   out_dtype=jnp.bfloat16, keep_n_pad=False):
    """out = act((a @ wm) * scale + bias [+ residual]); wm/scale/bias pre-padded."""
    M, K = a.shape
    Kp, Np = wm.shape
    tm, Mp = _pick_tile_m(M)
    tn = _pick_tile_n(Np)
    # Keep >= 2 parallel grid blocks so v7x's second TensorCore gets work.
    if (Mp // tm) * (Np // tn) == 1:
        if tn >= 256 and tn % 256 == 0:
            tn //= 2
        elif tm >= 16 and tm % 16 == 0:
            tm //= 2
    a = a.astype(jnp.bfloat16)
    if Mp != M or Kp != K:
        a = jnp.pad(a, ((0, Mp - M), (0, Kp - K)))
    args = [a, wm, scale, bias]
    if residual is not None:
        r = residual.astype(jnp.bfloat16)
        rM, rN = r.shape
        if Mp != rM or Np != rN:
            r = jnp.pad(r, ((0, Mp - rM), (0, Np - rN)))
        args.append(r)
    out = _mm_call(Mp, Kp, Np, tm, tn, bool(relu), residual is not None,
                   jnp.dtype(out_dtype).name)(*args)
    if Mp != M:
        out = out[:M]
    if (not keep_n_pad) and Np != n_valid:
        out = out[:, :n_valid]
    return out


# -----------------------------------------------------------------------------
# Convolution = im2col (fused in per-layer jit, bf16) + fused Pallas matmul
# -----------------------------------------------------------------------------
def _im2col(x, k, stride, pad):
    N, H, W, C = x.shape
    Ho = (H + 2 * pad - k) // stride + 1
    Wo = (W + 2 * pad - k) // stride + 1
    if k == 1 and pad == 0:
        xs = x if stride == 1 else x[:, ::stride, ::stride, :]
        return xs.reshape(N * Ho * Wo, C), (N, Ho, Wo)
    xp = jnp.pad(x, ((0, 0), (pad, pad), (pad, pad), (0, 0)))
    cols = []
    for i in range(k):
        for j in range(k):
            cols.append(xp[:, i:i + stride * (Ho - 1) + 1:stride,
                           j:j + stride * (Wo - 1) + 1:stride, :])
    patches = jnp.concatenate(cols, axis=-1)              # (N, Ho, Wo, k*k*C) bf16
    return patches.reshape(N * Ho * Wo, k * k * C), (N, Ho, Wo)


@functools.lru_cache(maxsize=None)
def _conv_bn_fn(k, stride, pad, cout, relu, has_res, keep_pad):
    def fn(x, wm, scale, bias, *res):
        cols, (N, Ho, Wo) = _im2col(x, k, stride, pad)
        residual = None
        if has_res:
            r = res[0]
            residual = r.reshape(N * Ho * Wo, r.shape[-1])
        y = _matmul_bn_act(cols, wm, scale, bias, cout, residual=residual,
                           relu=relu, keep_n_pad=keep_pad)
        return y.reshape(N, Ho, Wo, y.shape[-1])
    return jax.jit(fn)


def conv_bn(x, p, stride, pad, relu=True, residual=None, keep_pad=False):
    fn = _conv_bn_fn(p["k"], stride, pad, p["cout"], bool(relu),
                     residual is not None, bool(keep_pad))
    args = (x, p["wm"], p["scale"], p["bias"])
    if residual is not None:
        args = args + (residual,)
    return fn(*args)


# -----------------------------------------------------------------------------
# MaxPool 3x3 / stride 2 / pad 1 : two separable 3-tap passes (H then W), each a
# gridded, lane-dense elementwise-max Pallas kernel (no 9-way stack materialization).
# -----------------------------------------------------------------------------
def _max3_kernel(a_ref, b_ref, c_ref, o_ref):
    o_ref[...] = jnp.maximum(jnp.maximum(a_ref[...], b_ref[...]), c_ref[...])


@functools.lru_cache(maxsize=None)
def _max3_call(Rp, L, bm):
    in_specs = [pl.BlockSpec((bm, L), lambda i: (i, 0)) for _ in range(3)]
    return pl.pallas_call(
        _max3_kernel,
        out_shape=jax.ShapeDtypeStruct((Rp, L), jnp.bfloat16),
        grid_spec=pltpu.PrefetchScalarGridSpec(
            num_scalar_prefetch=0,
            grid=(Rp // bm,),
            in_specs=in_specs,
            out_specs=pl.BlockSpec((bm, L), lambda i: (i, 0))),
        compiler_params=pltpu.CompilerParams(
            dimension_semantics=("parallel",),
            vmem_limit_bytes=VMEM_LIMIT),
    )


def _max3(a, b, c):
    R, L = a.shape
    Rp = _round_up(R, 8)
    bm = math.gcd(Rp, 256)
    if Rp != R:
        a = jnp.pad(a, ((0, Rp - R), (0, 0)))
        b = jnp.pad(b, ((0, Rp - R), (0, 0)))
        c = jnp.pad(c, ((0, Rp - R), (0, 0)))
    out = _max3_call(Rp, L, bm)(a, b, c)
    return out[:R] if Rp != R else out


def _maxpool_impl(x):
    N, H, W, C = x.shape
    Ho = (H + 2 - 3) // 2 + 1
    Wo = (W + 2 - 3) // 2 + 1
    # Pass 1: 3-tap stride-2 max along H.
    xp = jnp.pad(x, ((0, 0), (1, 1), (0, 0), (0, 0)), constant_values=-jnp.inf)
    rows = [xp[:, i:i + 2 * (Ho - 1) + 1:2].reshape(N * Ho, W * C) for i in range(3)]
    h = _max3(*rows).reshape(N, Ho, W, C)
    # Pass 2: 3-tap stride-2 max along W.
    hp = jnp.pad(h, ((0, 0), (0, 0), (1, 1), (0, 0)), constant_values=-jnp.inf)
    cols = [hp[:, :, j:j + 2 * (Wo - 1) + 1:2].reshape(N * Ho, Wo * C) for j in range(3)]
    return _max3(*cols).reshape(N, Ho, Wo, C)


maxpool_3x3_s2_p1 = jax.jit(_maxpool_impl)


# -----------------------------------------------------------------------------
# Global average pool + classifier head (Pallas kernels)
# -----------------------------------------------------------------------------
def _gap_kernel(x_ref, o_ref):
    o_ref[...] = jnp.mean(x_ref[...].astype(jnp.float32), axis=1)


@functools.lru_cache(maxsize=None)
def _gap_call(N, HW, C):
    return pl.pallas_call(
        _gap_kernel,
        out_shape=jax.ShapeDtypeStruct((N, C), jnp.float32),
        compiler_params=pltpu.CompilerParams(vmem_limit_bytes=VMEM_LIMIT),
    )


@functools.lru_cache(maxsize=None)
def _head_fn(num_classes):
    def fn(x, fc_wm, fc_scale, fc_bias):
        N, H, W, C = x.shape
        pooled = _gap_call(N, H * W, C)(x.reshape(N, H * W, C))   # (N, C) f32
        return _matmul_bn_act(pooled, fc_wm, fc_scale, fc_bias, num_classes,
                              relu=False, out_dtype=jnp.float32)
    return jax.jit(fn)


# -----------------------------------------------------------------------------
# Parameters (deterministic, kaiming-normal fan_in like the PyTorch __init__).
# Weight-side work (transpose/reshape/pad/bf16 cast, BN folding) done ONCE here.
# K/N are padded to multiples of 128 (full-K tiles consume Kp in one dot).
# -----------------------------------------------------------------------------
def _prep_conv(key, cin, cout, k):
    fan_in = cin * k * k
    w = jax.random.normal(key, (cout, cin, k, k), jnp.float32) * math.sqrt(2.0 / fan_in)
    K = k * k * cin
    Kp, Np = _round_up(K, 128), _round_up(cout, 128)
    wm = jnp.transpose(w, (2, 3, 1, 0)).reshape(K, cout)
    wm = jnp.pad(wm, ((0, Kp - K), (0, Np - cout))).astype(jnp.bfloat16)
    # BN init: gamma=1, beta=0, running_mean=0, running_var=1 (inference form)
    scale = jnp.full((1, cout), 1.0 / math.sqrt(1.0 + BN_EPS), jnp.float32)
    scale = jnp.pad(scale, ((0, 0), (0, Np - cout)))
    bias = jnp.zeros((1, Np), jnp.float32)
    return {"wm": wm, "scale": scale, "bias": bias, "k": k, "cout": cout}


def _prep_fc(key, num_classes, cin=2048):
    w = jax.random.normal(key, (num_classes, cin), jnp.float32) * math.sqrt(2.0 / cin)
    b = jnp.zeros((num_classes,), jnp.float32)
    Kp, Np = _round_up(cin, 128), _round_up(num_classes, 128)
    wm = jnp.pad(w.T, ((0, Kp - cin), (0, Np - num_classes))).astype(jnp.bfloat16)
    scale = jnp.pad(jnp.ones((1, num_classes), jnp.float32),
                    ((0, 0), (0, Np - num_classes)))
    bias = jnp.pad(b.reshape(1, -1), ((0, 0), (0, Np - num_classes)))
    return {"wm": wm, "scale": scale, "bias": bias, "n": num_classes}


def make_params(num_classes=10, num_block_lists=(3, 4, 6, 3), seed=0):
    base = jax.random.PRNGKey(seed)
    ctr = [0]

    def nk():
        ctr[0] += 1
        return jax.random.fold_in(base, ctr[0])

    params = {"basic": _prep_conv(nk(), 3, 64, 7), "stages": []}
    stage_cfg = [(64, 64, 256, num_block_lists[0], 1),
                 (256, 128, 512, num_block_lists[1], 2),
                 (512, 256, 1024, num_block_lists[2], 2),
                 (1024, 512, 2048, num_block_lists[3], 2)]
    for cin, cmid, cout, nb, stride in stage_cfg:
        blocks = []
        for b in range(nb):
            ic = cin if b == 0 else cout
            bs = stride if b == 0 else 1
            blk = {
                "conv1": _prep_conv(nk(), ic, cmid, 1),
                "conv2": _prep_conv(nk(), cmid, cmid, 3),
                "conv3": _prep_conv(nk(), cmid, cout, 1),
                "stride": bs,
            }
            if ic != cout:
                blk["shortcut"] = _prep_conv(nk(), ic, cout, 1)
            blocks.append(blk)
        params["stages"].append(blocks)
    params["fc"] = _prep_fc(nk(), num_classes)
    return params


# -----------------------------------------------------------------------------
# Forward pass
# -----------------------------------------------------------------------------
def bottleneck_forward(x, bp):
    stride = bp["stride"]
    if "shortcut" in bp:
        residual = conv_bn(x, bp["shortcut"], stride=stride, pad=0, relu=False)
    else:
        residual = x
    h = conv_bn(x, bp["conv1"], stride=1, pad=0, relu=True)               # feeds 3x3
    # conv2 output may stay lane-padded (64->128) -- its consumer conv3 is 1x1 and its
    # weight rows for the padded channels are zero.
    h = conv_bn(h, bp["conv2"], stride=stride, pad=1, relu=True, keep_pad=True)
    # conv3 + BN + residual add + final ReLU fused in one Pallas matmul kernel
    return conv_bn(h, bp["conv3"], stride=1, pad=0, relu=True, residual=residual)


def resnet_forward(params, x_nchw):
    x = jnp.transpose(x_nchw, (0, 2, 3, 1)).astype(jnp.bfloat16)  # NCHW -> NHWC bf16
    # Stem output kept lane-padded to 128 channels; maxpool and the following 1x1
    # convs (stage-1 conv1 / shortcut) absorb the zero padding for free.
    x = conv_bn(x, params["basic"], stride=2, pad=3, relu=True, keep_pad=True)
    x = maxpool_3x3_s2_p1(x)
    for blocks in params["stages"]:
        for bp in blocks:
            x = bottleneck_forward(x, bp)
    fc = params["fc"]
    return _head_fn(fc["n"])(x, fc["wm"], fc["scale"], fc["bias"])   # (N, classes) f32


# -----------------------------------------------------------------------------
if __name__ == "__main__":
    num_classes = 10
    params = make_params(num_classes=num_classes)

    key = jax.random.PRNGKey(0)
    x = jax.random.normal(key, (2, 3, 64, 64), jnp.float32)  # NCHW, like PyTorch

    logits = resnet_forward(params, x)
    logits = jax.block_until_ready(logits)
    assert logits.shape == (2, num_classes)
    assert bool(jnp.all(jnp.isfinite(logits)))
    print("KERNEL_OK")
</pallas_src>

<mosaic_0001>
module attributes {stable_mosaic.version = 11 : i64} {
  func.func @kernel(%arg0: i32, %arg1: i32, %arg2: memref<512x256xbf16, #tpu.memory_space<vmem>>, %arg3: memref<256x128xbf16, #tpu.memory_space<vmem>>, %arg4: memref<1x128xf32, #tpu.memory_space<vmem>>, %arg5: memref<1x128xf32, #tpu.memory_space<vmem>>, %arg6: memref<512x128xbf16, #tpu.memory_space<vmem>>) attributes {dimension_semantics = [#tpu.dimension_semantics<parallel>, #tpu.dimension_semantics<parallel>], iteration_bounds = array<i64: 4, 1>, scalar_prefetch = 0 : i64, scratch_operands = 0 : i64, tpu.core_type = #tpu.core_type<tc>, window_params = [{transform_indices = @transform_0, window_bounds = array<i64: 512, 256>}, {transform_indices = @transform_1, window_bounds = array<i64: 256, 128>}, {transform_indices = @transform_2, window_bounds = array<i64: 1, 128>}, {transform_indices = @transform_3, window_bounds = array<i64: 1, 128>}, {transform_indices = @transform_4, window_bounds = array<i64: 512, 128>}]} {
    %c0 = arith.constant 0 : index
    %c0_0 = arith.constant 0 : index
    %0 = vector.load %arg2[%c0, %c0_0] : memref<512x256xbf16, #tpu.memory_space<vmem>>, vector<512x256xbf16>
    %c0_1 = arith.constant 0 : index
    %c0_2 = arith.constant 0 : index
    %1 = vector.load %arg3[%c0_1, %c0_2] : memref<256x128xbf16, #tpu.memory_space<vmem>>, vector<256x128xbf16>
    %cst = arith.constant dense<0.000000e+00> : vector<512x128xf32>
    %2 = tpu.matmul %0, %1, %cst {dimension_numbers = #tpu.dot_dimension_numbers<[1], [0], [0], [1], [0, 0, 1, 1], [], []>} : vector<512x256xbf16>, vector<256x128xbf16>, vector<512x128xf32> -> vector<512x128xf32>
    %c0_3 = arith.constant 0 : index
    %c0_4 = arith.constant 0 : index
    %3 = vector.load %arg4[%c0_3, %c0_4] : memref<1x128xf32, #tpu.memory_space<vmem>>, vector<1x128xf32>
    %4 = vector.broadcast %3 : vector<1x128xf32> to vector<512x128xf32>
    %5 = arith.mulf %2, %4 : vector<512x128xf32>
    %c0_5 = arith.constant 0 : index
    %c0_6 = arith.constant 0 : index
    %6 = vector.load %arg5[%c0_5, %c0_6] : memref<1x128xf32, #tpu.memory_space<vmem>>, vector<1x128xf32>
    %7 = vector.broadcast %6 : vector<1x128xf32> to vector<512x128xf32>
    %8 = arith.addf %5, %7 : vector<512x128xf32>
    %cst_7 = arith.constant 0.000000e+00 : f32
    %9 = vector.broadcast %cst_7 : f32 to vector<512x128xf32>
    %10 = arith.maximumf %8, %9 : vector<512x128xf32>
    %11 = arith.truncf %10 : vector<512x128xf32> to vector<512x128xbf16>
    %c0_8 = arith.constant 0 : index
    %c0_9 = arith.constant 0 : index
    %12 = vector.load %arg6[%c0_8, %c0_9] : memref<512x128xbf16, #tpu.memory_space<vmem>>, vector<512x128xbf16>
    tpu.vector_store %arg6[%c0_8, %c0_9], %11 {strides = array<i32>} : memref<512x128xbf16, #tpu.memory_space<vmem>>, vector<512x128xbf16>,
    return
  }
  func.func @transform_0(%arg0: i32, %arg1: i32) -> (i32, i32) {
    %c0_i32 = arith.constant 0 : i32
    %c0_i32_0 = arith.constant 0 : i32
    return %arg0, %c0_i32 : i32, i32
  }
  func.func @transform_1(%arg0: i32, %arg1: i32) -> (i32, i32) {
    %c0_i32 = arith.constant 0 : i32
    %c0_i32_0 = arith.constant 0 : i32
    return %c0_i32, %arg1 : i32, i32
  }
  func.func @transform_2(%arg0: i32, %arg1: i32) -> (i32, i32) {
    %c0_i32 = arith.constant 0 : i32
    %c0_i32_0 = arith.constant 0 : i32
    return %c0_i32, %arg1 : i32, i32
  }
  func.func @transform_3(%arg0: i32, %arg1: i32) -> (i32, i32) {
    %c0_i32 = arith.constant 0 : i32
    %c0_i32_0 = arith.constant 0 : i32
    return %c0_i32, %arg1 : i32, i32
  }
  func.func @transform_4(%arg0: i32, %arg1: i32) -> (i32, i32) {
    %c0_i32 = arith.constant 0 : i32
    return %arg0, %arg1 : i32, i32
  }
}

</mosaic_0001>

<bundles_post_ra>
// kernel: fn.1
= control target key start
LH: loop header
LB: loop body
LE: loop exit
PB: predicated region body
PF: predicated region fallthrough
CT: control target
= control target key end

     0   :  { %9 = vsyncpa [#allocation3], 0  ;;  %s2883_s0 = inlined_call_operand.vmem [shape: bf16[2048,256], index: 0, kind: input, shape index: {}]   ;;  %s2884_s1 = inlined_call_operand.vmem [shape: bf16[256,128], index: 1, kind: input, shape index: {}]   ;;  %s2885_s2 = inlined_call_operand.vmem [shape: f32[1,128], index: 2, kind: input, shape index: {}]   ;;  %s2886_s3 = inlined_call_operand.vmem [shape: f32[1,128], index: 3, kind: input, shape index: {}]   ;;  %s2887_s4 = inlined_call_operand.hbm [shape: bf16[2048,128], index: 4, kind: output, shape index: {}]  }
   0x1   :  { %11 = vsyncpa [#allocation3 + $0x1], 0  ;;  %s2446_s15 = smov 0   ;;  %s2448_s16 = smov 0  }
   0x2   :  { %s2450_s17 = smov 0   ;;  %s2452_s18 = smov 0  }
   0x3   :  { %s2454_s19 = smov 0   ;;  %s2456_s20 = smov 0  }
   0x4 LB: > { %s1715_s21 = sadd.s32 4294967295, %s2415_s20   ;;  %s1716_s22 = sadd.s32 4294967294, %s2415_s20   ;;  %s2415_s20 = sphi %s2456_s20, %s17_s20   ;;  %s2411_s19 = sphi %s2454_s19, %s2894_s19   ;;  %s2407_s18 = sphi %s2452_s18, %s2893_s18   ;;  %s2403_s17 = sphi %s2450_s17, %s2892_s17   ;;  %s2399_s16 = sphi %s2448_s16, %s2891_s16   ;;  %s2395_s15 = sphi %s2446_s15, %s2890_s15  }
   0x5   : > { %s29_s23 = sadd.s32 1, %s2411_s19  ;;  %s142_s24 = sadd.s32 1, %s2403_s17 }
   0x6   : > { %p31_p0 = scmp.ge.s32.totalorder %s29_s23, 4  ;;  %p152_p1 = scmp.ne.s32.totalorder %s2403_s17, %s2399_s16 }
   0x7   : > { %p153_p2 = scmp.eq.s32.totalorder %s1715_s21, 3  ;;  %p158_p3 = scmp.ne.s32.totalorder %s2399_s16, %s2395_s15 }
   0x8   : > { %s2896_s23 = smov (%p31_p0, %s29_s23), 0  ;;  %p159_p5 = scmp.eq.s32.totalorder %s1716_s22, 3 }
   0x9   : > { %p2486_p4 = por %p153_p2, %p152_p1  ;;  %s137_s26 = ssub.s32 %s2411_s19, %s2896_s23 }
   0xa   : > { %p1722_p6 = scmp.ge.s32.totalorder %s2415_s20, 1  ;;  %p140_p7 = scmp.eq.s32.totalorder %s137_s26, 0 }
   0xb   : > { %p2493_p8 = por %p159_p5, %p158_p3  ;;  %p206_p9 = scmp.lt.s32.totalorder %s2415_s20, 5 }
   0xc   : > { %s2499_s28 = scalar_select %p140_p7, %s2403_s17, %s142_s24  }
   0xd   : > { %p207_p10 = pnand %p1722_p6, %p206_p9 }
   0xe   : > { %v2225_v0 = vld [vmem:[%s2884_s1] sm:$0xff] (!%p207_p10)   ;;  %v2417_v1 = vmov (!%p207_p10), 0   ;;  %s1724_s5 = sshll.u32 (!%p207_p10), %s2407_s18, 6  ;;  %v2226_v2 = vld [vmem:[%s2884_s1 + $0x8] sm:$0xff] (!%p207_p10)   ;;  %v2227_v3 = vld [vmem:[%s2884_s1 + $0x10] sm:$0xff] (!%p207_p10)   ;;  %s1943_s21 = sshll.u32 (!%p207_p10), %s2407_s18, 12 }
   0xf   : > { %210 = sbr.rel (%p207_p10) target bundleno = 437 (0x1b5), region = 36  ;;  %774 = vmatprep.subr.bf16.mxu0 (!%p207_p10), %v2417_v1  ;;  %2135 = vmatprep.subr.bf16.mxu1 (!%p207_p10), %v2417_v1  ;;  %p244_p11 = scmp.lt.s32.totalorder (!%p207_p10), %s1724_s5, 255  ;;  %v2228_v4 = vld [vmem:[%s2884_s1 + $0x18] sm:$0xff] (!%p207_p10)   ;;  %v2229_v5 = vld [vmem:[%s2884_s1 + $0x20] sm:$0xff] (!%p207_p10)   ;;  %v2230_v7 = vld [vmem:[%s2884_s1 + $0x28] sm:$0xff] (!%p207_p10)  }
  0x10   : > { %775 = vmatpush1.bf16.msra.mxu0 (!%p207_p10), %v2225_v0  ;;  %2151 = vmatpush1.bf16.msra.mxu1 (!%p207_p10), %v2225_v0  ;;  %v2231_v9 = vld [vmem:[%s2884_s1 + $0x30] sm:$0xff] (!%p207_p10)   ;;  %v2232_v10 = vld [vmem:[%s2884_s1 + $0x38] sm:$0xff] (!%p207_p10)   ;;  %v2233_v11 = vld [vmem:[%s2884_s1 + $0x40] sm:$0xff] (!%p207_p10)   ;;  %s2829_s30 = scalar_lea.hbm (!%p207_p10), %s2887_s4, %s1943_s21  ;;  %s2418_s6 = smov (!%p207_p10), [#allocation2]  }
  0x11   : > { %776 = vmatprep.subr.bf16.mxu0 (!%p207_p10), %v2417_v1  ;;  %2136 = vmatprep.subr.bf16.mxu1 (!%p207_p10), %v2417_v1  ;;  %v2234_v12 = vld [vmem:[%s2884_s1 + $0x48] sm:$0xff] (!%p207_p10)   ;;  %v2235_v13 = vld [vmem:[%s2884_s1 + $0x50] sm:$0xff] (!%p207_p10)   ;;  %v2236_v14 = vld [vmem:[%s2884_s1 + $0x58] sm:$0xff] (!%p207_p10)   ;;  %s2341_s7 = sshll.u32 (!%p207_p10), %s2418_s6, 4  ;;  %s2342_s7 = int_to_ptr.vmem [resolvable:$false] %s2341_s7 }
  0x12   : > { %v2237_v15 = vld [vmem:[%s2884_s1 + $0x60] sm:$0xff] (!%p207_p10)   ;;  %v2238_v16 = vld [vmem:[%s2884_s1 + $0x68] sm:$0xff] (!%p207_p10)   ;;  %v2239_v17 = vld [vmem:[%s2884_s1 + $0x70] sm:$0xff] (!%p207_p10)   ;;  %s2343_s8 = scalar_lea.vmem (!%p207_p10), %s2342_s7, 8192 }
  0x13   : > { %v2240_v18 = vld [vmem:[%s2884_s1 + $0x78] sm:$0xff] (!%p207_p10)  }
  0x14   : > { %777 = vmatpush1.bf16.msra.mxu0 (!%p207_p10), %v2226_v2  ;;  %2152 = vmatpush1.bf16.msra.mxu1 (!%p207_p10), %v2226_v2 }
  0x15   : > { %778 = vmatprep.subr.bf16.mxu0 (!%p207_p10), %v2417_v1  ;;  %2137 = vmatprep.subr.bf16.mxu1 (!%p207_p10), %v2417_v1 }
  0x16   : > { %s2898_s5 = smov (!%p244_p11, %s1724_s5), 255 }
  0x17   : > { %s1878_s12 = sshll.u32 %s2898_s5, 3 }
  0x18   : > { %779 = vmatpush1.bf16.msra.mxu0 %v2227_v3  ;;  %2153 = vmatpush1.bf16.msra.mxu1 %v2227_v3  ;;  %s2528_s24 = scalar_lea.vmem %s2883_s0, %s1878_s12 }
  0x19   : > { %780 = vmatprep.subr.bf16.mxu0 %v2417_v1  ;;  %2138 = vmatprep.subr.bf16.mxu1 %v2417_v1  ;;  %v2243_v6 = vld [vmem:[%s2528_s24 + $0x4] ss:$8 sps:$4 sm:$0xff]   ;;  %v2241_v19 = vld [vmem:[%s2528_s24] ss:$8 sps:$4 sm:$0xff]   ;;  %v2247_v21 = vld [vmem:[%s2528_s24 + $0x14] ss:$8 sps:$4 sm:$0xff]  }
  0x1a   : > { %v2246_v8 = vld [vmem:[%s2528_s24 + $0x104] ss:$8 sps:$4 sm:$0xff]   ;;  %806 = vmatprep.mubr.bf16.mxu0 %v2243_v6  ;;  %v2244_v20 = vld [vmem:[%s2528_s24 + $0x100] ss:$8 sps:$4 sm:$0xff]   ;;  %v2249_v22 = vld [vmem:[%s2528_s24 + $0x114] ss:$8 sps:$4 sm:$0xff]  }
  0x1b   : > { %934 = vmatprep.mubr.bf16.mxu1 %v2246_v8  ;;  %v2251_v23 = vld [vmem:[%s2528_s24 + $0x10] ss:$8 sps:$4 sm:$0xff]   ;;  %v2253_v25 = vld [vmem:[%s2528_s24 + $0x24] ss:$8 sps:$4 sm:$0xff]   ;;  %v2257_v27 = vld [vmem:[%s2528_s24 + $0x20] ss:$8 sps:$4 sm:$0xff]  }
  0x1c   : > { %781 = vmatpush1.bf16.msra.mxu0 %v2228_v4  ;;  %2154 = vmatpush1.bf16.msra.mxu1 %v2228_v4  ;;  %v2252_v24 = vld [vmem:[%s2528_s24 + $0x110] ss:$8 sps:$4 sm:$0xff]   ;;  %v2255_v26 = vld [vmem:[%s2528_s24 + $0x124] ss:$8 sps:$4 sm:$0xff]   ;;  %v2258_v28 = vld [vmem:[%s2528_s24 + $0x120] ss:$8 sps:$4 sm:$0xff]  }
  0x1d   : > { %782 = vmatprep.subr.bf16.mxu0 %v2417_v1  ;;  %2139 = vmatprep.subr.bf16.mxu1 %v2417_v1  ;;  %v2259_v29 = vld [vmem:[%s2528_s24 + $0x34] ss:$8 sps:$4 sm:$0xff]   ;;  %v2263_v31 = vld [vmem:[%s2528_s24 + $0x30] ss:$8 sps:$4 sm:$0xff]   ;;  %v2265_v33 = vld [vmem:[%s2528_s24 + $0x44] ss:$8 sps:$4 sm:$0xff]  }
  0x1e   : > { %v2261_v30 = vld [vmem:[%s2528_s24 + $0x134] ss:$8 sps:$4 sm:$0xff]   ;;  %v2264_v32 = vld [vmem:[%s2528_s24 + $0x130] ss:$8 sps:$4 sm:$0xff]   ;;  %v2267_v34 = vld [vmem:[%s2528_s24 + $0x144] ss:$8 sps:$4 sm:$0xff]  }
  0x1f   : > { %v2269_v35 = vld [vmem:[%s2528_s24 + $0x40] ss:$8 sps:$4 sm:$0xff]   ;;  %v2271_v37 = vld [vmem:[%s2528_s24 + $0x54] ss:$8 sps:$4 sm:$0xff]   ;;  %v2275_v39 = vld [vmem:[%s2528_s24 + $0x50] ss:$8 sps:$4 sm:$0xff]  }
  0x20   : > { %783 = vmatpush1.bf16.msra.mxu0 %v2229_v5  ;;  %2155 = vmatpush1.bf16.msra.mxu1 %v2229_v5  ;;  %v2270_v36 = vld [vmem:[%s2528_s24 + $0x140] ss:$8 sps:$4 sm:$0xff]   ;;  %v2273_v38 = vld [vmem:[%s2528_s24 + $0x154] ss:$8 sps:$4 sm:$0xff]   ;;  %v2276_v40 = vld [vmem:[%s2528_s24 + $0x150] ss:$8 sps:$4 sm:$0xff]  }
  0x21   : > { %784 = vmatprep.subr.bf16.mxu0 %v2417_v1  ;;  %2140 = vmatprep.subr.bf16.mxu1 %v2417_v1  ;;  %v2277_v41 = vld [vmem:[%s2528_s24 + $0x64] ss:$8 sps:$4 sm:$0xff]   ;;  %v2281_v43 = vld [vmem:[%s2528_s24 + $0x60] ss:$8 sps:$4 sm:$0xff]   ;;  %v2283_v45 = vld [vmem:[%s2528_s24 + $0x74] ss:$8 sps:$4 sm:$0xff]  }
  0x22   : > { %v2279_v42 = vld [vmem:[%s2528_s24 + $0x164] ss:$8 sps:$4 sm:$0xff]   ;;  %v2282_v44 = vld [vmem:[%s2528_s24 + $0x160] ss:$8 sps:$4 sm:$0xff]   ;;  %v2285_v46 = vld [vmem:[%s2528_s24 + $0x174] ss:$8 sps:$4 sm:$0xff]  }
  0x23   : > { %v2287_v47 = vld [vmem:[%s2528_s24 + $0x70] ss:$8 sps:$4 sm:$0xff]   ;;  %v2289_v49 = vld [vmem:[%s2528_s24 + $0x84] ss:$8 sps:$4 sm:$0xff]   ;;  %v2293_v51 = vld [vmem:[%s2528_s24 + $0x80] ss:$8 sps:$4 sm:$0xff]  }
  0x24   : > { %785 = vmatpush1.bf16.msra.mxu0 %v2230_v7  ;;  %2156 = vmatpush1.bf16.msra.mxu1 %v2230_v7  ;;  %v2288_v48 = vld [vmem:[%s2528_s24 + $0x170] ss:$8 sps:$4 sm:$0xff]   ;;  %v2291_v50 = vld [vmem:[%s2528_s24 + $0x184] ss:$8 sps:$4 sm:$0xff]   ;;  %v2294_v52 = vld [vmem:[%s2528_s24 + $0x180] ss:$8 sps:$4 sm:$0xff]  }
  0x25   : > { %786 = vmatprep.subr.bf16.mxu0 %v2417_v1  ;;  %2141 = vmatprep.subr.bf16.mxu1 %v2417_v1  ;;  %v2295_v53 = vld [vmem:[%s2528_s24 + $0x94] ss:$8 sps:$4 sm:$0xff]   ;;  %v2299_v55 = vld [vmem:[%s2528_s24 + $0x90] ss:$8 sps:$4 sm:$0xff]   ;;  %v2301_v57 = vld [vmem:[%s2528_s24 + $0xa4] ss:$8 sps:$4 sm:$0xff]  }
  0x26   : > { %v2297_v54 = vld [vmem:[%s2528_s24 + $0x194] ss:$8 sps:$4 sm:$0xff]   ;;  %v2300_v56 = vld [vmem:[%s2528_s24 + $0x190] ss:$8 sps:$4 sm:$0xff]   ;;  %v2303_v58 = vld [vmem:[%s2528_s24 + $0x1a4] ss:$8 sps:$4 sm:$0xff]  }
  0x27   : > { %v2305_v59 = vld [vmem:[%s2528_s24 + $0xa0] ss:$8 sps:$4 sm:$0xff]   ;;  %v2307_v61 = vld [vmem:[%s2528_s24 + $0xb4] ss:$8 sps:$4 sm:$0xff]   ;;  %v2311_v63 = vld [vmem:[%s2528_s24 + $0xb0] ss:$8 sps:$4 sm:$0xff]  }
  0x28   : > { %787 = vmatpush1.bf16.msra.mxu0 %v2231_v9  ;;  %2157 = vmatpush1.bf16.msra.mxu1 %v2231_v9  ;;  %v2306_v60 = vld [vmem:[%s2528_s24 + $0x1a0] ss:$8 sps:$4 sm:$0xff]   ;;  %v2309_v62 = vld [vmem:[%s2528_s24 + $0x1b4] ss:$8 sps:$4 sm:$0xff]   ;;  %v2312_v0 = vld [vmem:[%s2528_s24 + $0x1b0] ss:$8 sps:$4 sm:$0xff]  }
  0x29   : > { %788 = vmatprep.subr.bf16.mxu0 %v2417_v1  ;;  %2142 = vmatprep.subr.bf16.mxu1 %v2417_v1  ;;  %v2315_v2 = vld [vmem:[%s2528_s24 + $0x1c4] ss:$8 sps:$4 sm:$0xff]   ;;  %v2317_v3 = vld [vmem:[%s2528_s24 + $0xc0] ss:$8 sps:$4 sm:$0xff]   ;;  %v2319_v5 = vld [vmem:[%s2528_s24 + $0xd4] ss:$8 sps:$4 sm:$0xff]  }
  0x2a   : > { %v2318_v4 = vld [vmem:[%s2528_s24 + $0x1c0] ss:$8 sps:$4 sm:$0xff]   ;;  %v2321_v6 = vld [vmem:[%s2528_s24 + $0x1d4] ss:$8 sps:$4 sm:$0xff]   ;;  %v2323_v7 = vld [vmem:[%s2528_s24 + $0xd0] ss:$8 sps:$4 sm:$0xff]  }
  0x2b   : > { %v2324_v8 = vld [vmem:[%s2528_s24 + $0x1d0] ss:$8 sps:$4 sm:$0xff]   ;;  %v2325_v9 = vld [vmem:[%s2528_s24 + $0xe4] ss:$8 sps:$4 sm:$0xff]  }
  0x2c   : > { %789 = vmatpush1.bf16.msra.mxu0 %v2232_v10  ;;  %2158 = vmatpush1.bf16.msra.mxu1 %v2232_v10  ;;  %v2327_v10 = vld [vmem:[%s2528_s24 + $0x1e4] ss:$8 sps:$4 sm:$0xff]  }
  0x2d   : > { %790 = vmatprep.subr.bf16.mxu0 %v2417_v1  ;;  %2143 = vmatprep.subr.bf16.mxu1 %v2417_v1 }
  0x30   : > { %791 = vmatpush1.bf16.msra.mxu0 %v2233_v11  ;;  %2159 = vmatpush1.bf16.msra.mxu1 %v2233_v11  ;;  %v2329_v11 = vld [vmem:[%s2528_s24 + $0xe0] ss:$8 sps:$4 sm:$0xff]  }
  0x31   : > { %792 = vmatprep.subr.bf16.mxu0 %v2417_v1  ;;  %2144 = vmatprep.subr.bf16.mxu1 %v2417_v1 }
  0x34   : > { %793 = vmatpush1.bf16.msra.mxu0 %v2234_v12  ;;  %2160 = vmatpush1.bf16.msra.mxu1 %v2234_v12  ;;  %v2330_v12 = vld [vmem:[%s2528_s24 + $0x1e0] ss:$8 sps:$4 sm:$0xff]  }
  0x35   : > { %794 = vmatprep.subr.bf16.mxu0 %v2417_v1  ;;  %2145 = vmatprep.subr.bf16.mxu1 %v2417_v1 }
  0x38   : > { %795 = vmatpush1.bf16.msra.mxu0 %v2235_v13  ;;  %2161 = vmatpush1.bf16.msra.mxu1 %v2235_v13  ;;  %v2331_v13 = vld [vmem:[%s2528_s24 + $0xf4] ss:$8 sps:$4 sm:$0xff]  }
  0x39   : > { %796 = vmatprep.subr.bf16.mxu0 %v2417_v1  ;;  %2146 = vmatprep.subr.bf16.mxu1 %v2417_v1 }
  0x3c   : > { %797 = vmatpush1.bf16.msra.mxu0 %v2236_v14  ;;  %2162 = vmatpush1.bf16.msra.mxu1 %v2236_v14  ;;  %v2333_v14 = vld [vmem:[%s2528_s24 + $0x1f4] ss:$8 sps:$4 sm:$0xff]  }
  0x3d   : > { %798 = vmatprep.subr.bf16.mxu0 %v2417_v1  ;;  %2147 = vmatprep.subr.bf16.mxu1 %v2417_v1 }
  0x40   : > { %799 = vmatpush1.bf16.msra.mxu0 %v2237_v15  ;;  %2163 = vmatpush1.bf16.msra.mxu1 %v2237_v15  ;;  %v2335_v15 = vld [vmem:[%s2528_s24 + $0xf0] ss:$8 sps:$4 sm:$0xff]  }
  0x41   : > { %800 = vmatprep.subr.bf16.mxu0 %v2417_v1  ;;  %2148 = vmatprep.subr.bf16.mxu1 %v2417_v1 }
  0x44   : > { %801 = vmatpush1.bf16.msra.mxu0 %v2238_v16  ;;  %2164 = vmatpush1.bf16.msra.mxu1 %v2238_v16  ;;  %v2336_v16 = vld [vmem:[%s2528_s24 + $0x1f0] ss:$8 sps:$4 sm:$0xff]  }
  0x45   : > { %802 = vmatprep.subr.bf16.mxu0 %v2417_v1  ;;  %2149 = vmatprep.subr.bf16.mxu1 %v2417_v1 }
  0x48   : > { %803 = vmatpush1.bf16.msra.mxu0 %v2239_v17  ;;  %2165 = vmatpush1.bf16.msra.mxu1 %v2239_v17  ;;  %v2654_v17 = vld [vmem:[%s2885_s2] ss:$0 sm:$0xff] }
  0x49   : > { %804 = vmatprep.subr.bf16.mxu0 %v2417_v1  ;;  %2150 = vmatprep.subr.bf16.mxu1 %v2417_v1  ;;  %v2313_v1 = vld [vmem:[%s2528_s24 + $0xc4] ss:$8 sps:$4 sm:$0xff]   ;;  %s240_s24 = sand.u32 1, %s2399_s16  }
  0x4a   : > { %s1723_s13 = sshll.u32 %s240_s24, 8  ;;  %s2837_s18 = scalar_lea.sflag [#allocation3], %s240_s24 }
  0x4b   : > { %s2674_s14 = scalar_lea.vmem [#allocation2], %s1723_s13 }
  0x4c   : > { %805 = vmatpush1.bf16.msra.mxu0 %v2240_v18  ;;  %2166 = vmatpush1.bf16.msra.mxu1 %v2240_v18  ;;  %s1604_s22 = sshll.u32 %s2674_s14, 4  ;;  %s2831_s22 = int_to_ptr.vmem [resolvable:$true] %s1604_s22 }
  0x4d   : > { %s2337_s5 = scalar_lea.vmem %s2831_s22, 4096  ;;  %p2344_p1 = scmp.lt.s32.totalorder %s2831_s22, %s2342_s7 }
  0x4e   : > { %p2338_p12 = scmp.ne.s32.totalorder %s2831_s22, %s2337_s5  ;;  %p2345_p2 = scmp.lt.s32.totalorder %s2343_s8, %s2337_s5 }
  0x4f   : > { %807 = vmatmul.mubr.bf16.vlgmr.msra.gmra.mrb[0].mxu0 %v2241_v19  ;;  %935 = vmatmul.mubr.bf16.vlgmr.msra.gmra.mrb[0].mxu1 %v2244_v20  ;;  %v2659_v19 = vld [vmem:[%s2886_s3] ss:$0 sm:$0xff] }
  0x50   : > { %814 = vmatprep.mubr.bf16.mxu0 %v2247_v21  ;;  %942 = vmatprep.mubr.bf16.mxu1 %v2249_v22  ;;  %p2339_p13 = pnand %p2338_p12, %p2486_p4  ;;  %p2346_p3 = por %p2345_p2, %p2344_p1 }
  0x52   : > { %p2340_p0 = pneg %p2339_p13 }
  0x54   : > { %p2347_p5 = pnand %p2346_p3, %p2340_p0 }
  0x57   : > { %815 = vmatmul.mubr.bf16.gmra.mrb[4].mxu0 %v2251_v23  ;;  %943 = vmatmul.mubr.bf16.gmra.mrb[4].mxu1 %v2252_v24 }
  0x58   : > { %822 = vmatprep.mubr.bf16.mxu0 %v2253_v25  ;;  %950 = vmatprep.mubr.bf16.mxu1 %v2255_v26 }
  0x5f   : > { %823 = vmatmul.mubr.bf16.gmra.mrb[8].mxu0 %v2257_v27  ;;  %951 = vmatmul.mubr.bf16.gmra.mrb[8].mxu1 %v2258_v28 }
  0x60   : > { %830 = vmatprep.mubr.bf16.mxu0 %v2259_v29  ;;  %958 = vmatprep.mubr.bf16.mxu1 %v2261_v30 }
  0x67   : > { %831 = vmatmul.mubr.bf16.gmra.mrb[12].mxu0 %v2263_v31  ;;  %959 = vmatmul.mubr.bf16.gmra.mrb[12].mxu1 %v2264_v32 }
  0x68   : > { %838 = vmatprep.mubr.bf16.mxu0 %v2265_v33  ;;  %966 = vmatprep.mubr.bf16.mxu1 %v2267_v34 }
  0x6f   : > { %839 = vmatmul.mubr.bf16.gmra.mrb[16].mxu0 %v2269_v35  ;;  %967 = vmatmul.mubr.bf16.gmra.mrb[16].mxu1 %v2270_v36 }
  0x70   : > { %846 = vmatprep.mubr.bf16.mxu0 %v2271_v37  ;;  %974 = vmatprep.mubr.bf16.mxu1 %v2273_v38 }
  0x77   : > { %847 = vmatmul.mubr.bf16.gmra.mrb[20].mxu0 %v2275_v39  ;;  %975 = vmatmul.mubr.bf16.gmra.mrb[20].mxu1 %v2276_v40 }
  0x78   : > { %854 = vmatprep.mubr.bf16.mxu0 %v2277_v41  ;;  %982 = vmatprep.mubr.bf16.mxu1 %v2279_v42 }
  0x7f   : > { %855 = vmatmul.mubr.bf16.gmra.mrb[24].mxu0 %v2281_v43  ;;  %983 = vmatmul.mubr.bf16.gmra.mrb[24].mxu1 %v2282_v44 }
  0x80   : > { %862 = vmatprep.mubr.bf16.mxu0 %v2283_v45  ;;  %990 = vmatprep.mubr.bf16.mxu1 %v2285_v46 }
  0x87   : > { %863 = vmatmul.mubr.bf16.gmra.mrb[28].mxu0 %v2287_v47  ;;  %991 = vmatmul.mubr.bf16.gmra.mrb[28].mxu1 %v2288_v48 }
  0x88   : > { %870 = vmatprep.mubr.bf16.mxu0 %v2289_v49  ;;  %998 = vmatprep.mubr.bf16.mxu1 %v2291_v50 }
  0x8f   : > { %871 = vmatmul.mubr.bf16.gmra.mrb[32].mxu0 %v2293_v51  ;;  %999 = vmatmul.mubr.bf16.gmra.mrb[32].mxu1 %v2294_v52 }
  0x90   : > { %878 = vmatprep.mubr.bf16.mxu0 %v2295_v53  ;;  %1006 = vmatprep.mubr.bf16.mxu1 %v2297_v54 }
  0x97   : > { %879 = vmatmul.mubr.bf16.gmra.mrb[36].mxu0 %v2299_v55  ;;  %1007 = vmatmul.mubr.bf16.gmra.mrb[36].mxu1 %v2300_v56 }
  0x98   : > { %886 = vmatprep.mubr.bf16.mxu0 %v2301_v57  ;;  %1014 = vmatprep.mubr.bf16.mxu1 %v2303_v58 }
  0x9f   : > { %887 = vmatmul.mubr.bf16.gmra.mrb[40].mxu0 %v2305_v59  ;;  %1015 = vmatmul.mubr.bf16.gmra.mrb[40].mxu1 %v2306_v60 }
  0xa0   : > { %894 = vmatprep.mubr.bf16.mxu0 %v2307_v61  ;;  %1022 = vmatprep.mubr.bf16.mxu1 %v2309_v62 }
  0xa7   : > { %895 = vmatmul.mubr.bf16.gmra.mrb[44].mxu0 %v2311_v63  ;;  %1023 = vmatmul.mubr.bf16.gmra.mrb[44].mxu1 %v2312_v0 }
  0xa8   : > { %902 = vmatprep.mubr.bf16.mxu0 %v2313_v1  ;;  %1030 = vmatprep.mubr.bf16.mxu1 %v2315_v2 }
  0xaf   : > { %903 = vmatmul.mubr.bf16.gmra.mrb[48].mxu0 %v2317_v3  ;;  %1031 = vmatmul.mubr.bf16.gmra.mrb[48].mxu1 %v2318_v4 }
  0xb0   : > { %910 = vmatprep.mubr.bf16.mxu0 %v2319_v5  ;;  %1038 = vmatprep.mubr.bf16.mxu1 %v2321_v6 }
  0xb7   : > { %911 = vmatmul.mubr.bf16.gmra.mrb[52].mxu0 %v2323_v7  ;;  %1039 = vmatmul.mubr.bf16.gmra.mrb[52].mxu1 %v2324_v8 }
  0xb8   : > { %918 = vmatprep.mubr.bf16.mxu0 %v2325_v9  ;;  %1046 = vmatprep.mubr.bf16.mxu1 %v2327_v10 }
  0xbf   : > { %919 = vmatmul.mubr.bf16.gmra.mrb[56].mxu0 %v2329_v11  ;;  %1047 = vmatmul.mubr.bf16.gmra.mrb[56].mxu1 %v2330_v12 }
  0xc0   : > { %926 = vmatprep.mubr.bf16.mxu0 %v2331_v13  ;;  %1054 = vmatprep.mubr.bf16.mxu1 %v2333_v14 }
  0xc7   : > { %927 = vmatmul.mubr.bf16.gmra.mrb[60].mxu0 %v2335_v15  ;;  %1055 = vmatmul.mubr.bf16.gmra.mrb[60].mxu1 %v2336_v16 }
 0x122   : > { %v808_v18 = vpop.f32.mrb[0].mxu0  ;;  %v936_v20 = vpop.f32.mrb[0].mxu1 }
 0x123   : > { %v1070_v21 = vmul.f32 %v2654_v17, %v808_v18  ;;  %v1102_v22 = vmul.f32 %v2654_v17, %v936_v20  ;;  %v810_v23 = vpop.f32.mrb[1].mxu0  ;;  %v938_v24 = vpop.f32.mrb[1].mxu1 }
 0x124   : > { %v811_v25 = vpop.f32.mrb[2].mxu0  ;;  %v939_v26 = vpop.f32.mrb[2].mxu1 }
 0x125   : > { %v1141_v27 = vadd.f32 %v2659_v19, %v1070_v21  ;;  %v1173_v28 = vadd.f32 %v2659_v19, %v1102_v22  ;;  %v1071_v29 = vmul.f32 %v2654_v17, %v811_v25  ;;  %v1103_v30 = vmul.f32 %v2654_v17, %v939_v26  ;;  %v813_v31 = vpop.f32.mrb[3].mxu0  ;;  %v941_v32 = vpop.f32.mrb[3].mxu1 }
 0x127   : > { %v1142_v33 = vadd.f32 %v2659_v19, %v1071_v29  ;;  %v1174_v34 = vadd.f32 %v2659_v19, %v1103_v30  ;;  %v1205_v35 = vmax.f32 %v1141_v27, 0.0  ;;  %v1237_v36 = vmax.f32 %v1173_v28, 0.0 }
 0x129   : > { %v1206_v37 = vmax.f32 %v1142_v33, 0.0  ;;  %v1238_v38 = vmax.f32 %v1174_v34, 0.0 }
 0x12a   : > { %v816_v39 = vpop.f32.mrb[4].mxu0  ;;  %v944_v40 = vpop.f32.mrb[4].mxu1 }
 0x12b   : > { %v1947_v41 = vpack.c.bf16 %v1206_v37, %v1205_v35  ;;  %v2027_v42 = vpack.c.bf16 %v1238_v38, %v1237_v36  ;;  %v1072_v43 = vmul.f32 %v2654_v17, %v816_v39  ;;  %v1104_v44 = vmul.f32 %v2654_v17, %v944_v40  ;;  %v818_v45 = vpop.f32.mrb[5].mxu0  ;;  %v946_v46 = vpop.f32.mrb[5].mxu1 }
 0x12c   : > { %v819_v47 = vpop.f32.mrb[6].mxu0  ;;  %v947_v48 = vpop.f32.mrb[6].mxu1 }
 0x12d   : > { %1948 = vst [vmem:[%s2674_s14] sm:$0xff] %v1947_v41   ;;  %2119 = vst [vmem:[%s2674_s14 + $0x80] sm:$0xff] %v2027_v42   ;;  %v1143_v49 = vadd.f32 %v2659_v19, %v1072_v43  ;;  %v1175_v50 = vadd.f32 %v2659_v19, %v1104_v44  ;;  %v1073_v51 = vmul.f32 %v2654_v17, %v819_v47  ;;  %v821_v53 = vpop.f32.mrb[7].mxu0  ;;  %v949_v54 = vpop.f32.mrb[7].mxu1 }
 0x12e   : > { %v1105_v52 = vmul.f32 %v2654_v17, %v947_v48 }
 0x12f   : > { %v1144_v55 = vadd.f32 %v2659_v19, %v1073_v51  ;;  %v1207_v57 = vmax.f32 %v1143_v49, 0.0  ;;  %v1239_v58 = vmax.f32 %v1175_v50, 0.0 }
 0x130   : > { %v1176_v56 = vadd.f32 %v2659_v19, %v1105_v52 }
 0x131   : > { %v1208_v59 = vmax.f32 %v1144_v55, 0.0 }
 0x132   : > { %v1240_v60 = vmax.f32 %v1176_v56, 0.0  ;;  %v824_v61 = vpop.f32.mrb[8].mxu0  ;;  %v952_v62 = vpop.f32.mrb[8].mxu1 }
 0x133   : > { %v1952_v63 = vpack.c.bf16 %v1208_v59, %v1207_v57  ;;  %v1074_v1 = vmul.f32 %v2654_v17, %v824_v61  ;;  %v1106_v2 = vmul.f32 %v2654_v17, %v952_v62  ;;  %v826_v3 = vpop.f32.mrb[9].mxu0  ;;  %v954_v4 = vpop.f32.mrb[9].mxu1 }
 0x134   : > { %v2032_v0 = vpack.c.bf16 %v1240_v60, %v1239_v58  ;;  %v827_v5 = vpop.f32.mrb[10].mxu0  ;;  %v955_v6 = vpop.f32.mrb[10].mxu1 }
 0x135   : > { %2104 = vst [vmem:[%s2674_s14 + $0x8] sm:$0xff] %v1952_v63   ;;  %v1145_v7 = vadd.f32 %v2659_v19, %v1074_v1  ;;  %v1177_v8 = vadd.f32 %v2659_v19, %v1106_v2  ;;  %v1075_v9 = vmul.f32 %v2654_v17, %v827_v5  ;;  %v1107_v10 = vmul.f32 %v2654_v17, %v955_v6  ;;  %v829_v11 = vpop.f32.mrb[11].mxu0  ;;  %v957_v12 = vpop.f32.mrb[11].mxu1 }
 0x136   : > { %2120 = vst [vmem:[%s2674_s14 + $0x88] sm:$0xff] %v2032_v0  }
 0x137   : > { %v1146_v13 = vadd.f32 %v2659_v19, %v1075_v9  ;;  %v1178_v14 = vadd.f32 %v2659_v19, %v1107_v10  ;;  %v1209_v15 = vmax.f32 %v1145_v7, 0.0  ;;  %v1241_v16 = vmax.f32 %v1177_v8, 0.0 }
 0x139   : > { %v1210_v18 = vmax.f32 %v1146_v13, 0.0  ;;  %v1242_v20 = vmax.f32 %v1178_v14, 0.0 }
 0x13a   : > { %v832_v21 = vpop.f32.mrb[12].mxu0  ;;  %v960_v22 = vpop.f32.mrb[12].mxu1 }
 0x13b   : > { %v1957_v23 = vpack.c.bf16 %v1210_v18, %v1209_v15  ;;  %v2037_v24 = vpack.c.bf16 %v1242_v20, %v1241_v16  ;;  %v1076_v25 = vmul.f32 %v2654_v17, %v832_v21  ;;  %v1108_v26 = vmul.f32 %v2654_v17, %v960_v22  ;;  %v834_v27 = vpop.f32.mrb[13].mxu0  ;;  %v962_v28 = vpop.f32.mrb[13].mxu1 }
 0x13c   : > { %v835_v29 = vpop.f32.mrb[14].mxu0  ;;  %v963_v30 = vpop.f32.mrb[14].mxu1 }
 0x13d   : > { %2105 = vst [vmem:[%s2674_s14 + $0x10] sm:$0xff] %v1957_v23   ;;  %2121 = vst [vmem:[%s2674_s14 + $0x90] sm:$0xff] %v2037_v24   ;;  %v1147_v31 = vadd.f32 %v2659_v19, %v1076_v25  ;;  %v1179_v32 = vadd.f32 %v2659_v19, %v1108_v26  ;;  %v1077_v33 = vmul.f32 %v2654_v17, %v835_v29  ;;  %v837_v35 = vpop.f32.mrb[15].mxu0  ;;  %v965_v36 = vpop.f32.mrb[15].mxu1 }
 0x13e   : > { %v1109_v34 = vmul.f32 %v2654_v17, %v963_v30 }
 0x13f   : > { %v1148_v37 = vadd.f32 %v2659_v19, %v1077_v33  ;;  %v1211_v39 = vmax.f32 %v1147_v31, 0.0  ;;  %v1243_v40 = vmax.f32 %v1179_v32, 0.0 }
 0x140   : > { %v1180_v38 = vadd.f32 %v2659_v19, %v1109_v34 }
 0x141   : > { %v1212_v41 = vmax.f32 %v1148_v37, 0.0 }
 0x142   : > { %v1244_v42 = vmax.f32 %v1180_v38, 0.0  ;;  %v840_v43 = vpop.f32.mrb[16].mxu0  ;;  %v968_v44 = vpop.f32.mrb[16].mxu1 }
 0x143   : > { %v1962_v45 = vpack.c.bf16 %v1212_v41, %v1211_v39  ;;  %v1078_v47 = vmul.f32 %v2654_v17, %v840_v43  ;;  %v1110_v48 = vmul.f32 %v2654_v17, %v968_v44  ;;  %v842_v49 = vpop.f32.mrb[17].mxu0  ;;  %v970_v50 = vpop.f32.mrb[17].mxu1 }
 0x144   : > { %v2042_v46 = vpack.c.bf16 %v1244_v42, %v1243_v40  ;;  %v843_v51 = vpop.f32.mrb[18].mxu0  ;;  %v971_v52 = vpop.f32.mrb[18].mxu1 }
 0x145   : > { %2106 = vst [vmem:[%s2674_s14 + $0x18] sm:$0xff] %v1962_v45   ;;  %v1149_v53 = vadd.f32 %v2659_v19, %v1078_v47  ;;  %v1181_v54 = vadd.f32 %v2659_v19, %v1110_v48  ;;  %v1079_v55 = vmul.f32 %v2654_v17, %v843_v51  ;;  %v1111_v56 = vmul.f32 %v2654_v17, %v971_v52  ;;  %v845_v57 = vpop.f32.mrb[19].mxu0  ;;  %v973_v58 = vpop.f32.mrb[19].mxu1 }
 0x146   : > { %2122 = vst [vmem:[%s2674_s14 + $0x98] sm:$0xff] %v2042_v46  }
 0x147   : > { %v1150_v59 = vadd.f32 %v2659_v19, %v1079_v55  ;;  %v1182_v60 = vadd.f32 %v2659_v19, %v1111_v56  ;;  %v1213_v61 = vmax.f32 %v1149_v53, 0.0  ;;  %v1245_v62 = vmax.f32 %v1181_v54, 0.0 }
 0x149   : > { %v1214_v63 = vmax.f32 %v1150_v59, 0.0  ;;  %v1246_v0 = vmax.f32 %v1182_v60, 0.0 }
 0x14a   : > { %v848_v1 = vpop.f32.mrb[20].mxu0  ;;  %v976_v2 = vpop.f32.mrb[20].mxu1 }
 0x14b   : > { %v1967_v3 = vpack.c.bf16 %v1214_v63, %v1213_v61  ;;  %v2047_v4 = vpack.c.bf16 %v1246_v0, %v1245_v62  ;;  %v1080_v5 = vmul.f32 %v2654_v17, %v848_v1  ;;  %v1112_v6 = vmul.f32 %v2654_v17, %v976_v2  ;;  %v850_v7 = vpop.f32.mrb[21].mxu0  ;;  %v978_v8 = vpop.f32.mrb[21].mxu1 }
 0x14c   : > { %v851_v9 = vpop.f32.mrb[22].mxu0  ;;  %v979_v10 = vpop.f32.mrb[22].mxu1 }
 0x14d   : > { %2107 = vst [vmem:[%s2674_s14 + $0x20] sm:$0xff] %v1967_v3   ;;  %2123 = vst [vmem:[%s2674_s14 + $0xa0] sm:$0xff] %v2047_v4   ;;  %v1151_v11 = vadd.f32 %v2659_v19, %v1080_v5  ;;  %v1183_v12 = vadd.f32 %v2659_v19, %v1112_v6  ;;  %v1081_v13 = vmul.f32 %v2654_v17, %v851_v9  ;;  %v853_v15 = vpop.f32.mrb[23].mxu0  ;;  %v981_v16 = vpop.f32.mrb[23].mxu1 }
 0x14e   : > { %v1113_v14 = vmul.f32 %v2654_v17, %v979_v10 }
 0x14f   : > { %v1152_v18 = vadd.f32 %v2659_v19, %v1081_v13  ;;  %v1215_v21 = vmax.f32 %v1151_v11, 0.0  ;;  %v1247_v22 = vmax.f32 %v1183_v12, 0.0 }
 0x150   : > { %v1184_v20 = vadd.f32 %v2659_v19, %v1113_v14 }
 0x151   : > { %v1216_v23 = vmax.f32 %v1152_v18, 0.0 }
 0x152   : > { %v1248_v24 = vmax.f32 %v1184_v20, 0.0  ;;  %v856_v25 = vpop.f32.mrb[24].mxu0  ;;  %v984_v26 = vpop.f32.mrb[24].mxu1 }
 0x153   : > { %v1972_v27 = vpack.c.bf16 %v1216_v23, %v1215_v21  ;;  %v1082_v29 = vmul.f32 %v2654_v17, %v856_v25  ;;  %v1114_v30 = vmul.f32 %v2654_v17, %v984_v26  ;;  %v858_v31 = vpop.f32.mrb[25].mxu0  ;;  %v986_v32 = vpop.f32.mrb[25].mxu1 }
 0x154   : > { %v2052_v28 = vpack.c.bf16 %v1248_v24, %v1247_v22  ;;  %v859_v33 = vpop.f32.mrb[26].mxu0  ;;  %v987_v34 = vpop.f32.mrb[26].mxu1 }
 0x155   : > { %2108 = vst [vmem:[%s2674_s14 + $0x28] sm:$0xff] %v1972_v27   ;;  %v1153_v35 = vadd.f32 %v2659_v19, %v1082_v29  ;;  %v1185_v36 = vadd.f32 %v2659_v19, %v1114_v30  ;;  %v1083_v37 = vmul.f32 %v2654_v17, %v859_v33  ;;  %v1115_v38 = vmul.f32 %v2654_v17, %v987_v34  ;;  %v861_v39 = vpop.f32.mrb[27].mxu0  ;;  %v989_v40 = vpop.f32.mrb[27].mxu1 }
 0x156   : > { %2124 = vst [vmem:[%s2674_s14 + $0xa8] sm:$0xff] %v2052_v28  }
 0x157   : > { %v1154_v41 = vadd.f32 %v2659_v19, %v1083_v37  ;;  %v1186_v42 = vadd.f32 %v2659_v19, %v1115_v38  ;;  %v1217_v43 = vmax.f32 %v1153_v35, 0.0  ;;  %v1249_v44 = vmax.f32 %v1185_v36, 0.0 }
 0x159   : > { %v1218_v45 = vmax.f32 %v1154_v41, 0.0  ;;  %v1250_v46 = vmax.f32 %v1186_v42, 0.0 }
 0x15a   : > { %v864_v47 = vpop.f32.mrb[28].mxu0  ;;  %v992_v48 = vpop.f32.mrb[28].mxu1 }
 0x15b   : > { %v1977_v49 = vpack.c.bf16 %v1218_v45, %v1217_v43  ;;  %v2057_v50 = vpack.c.bf16 %v1250_v46, %v1249_v44  ;;  %v1084_v51 = vmul.f32 %v2654_v17, %v864_v47  ;;  %v1116_v52 = vmul.f32 %v2654_v17, %v992_v48  ;;  %v866_v53 = vpop.f32.mrb[29].mxu0  ;;  %v994_v54 = vpop.f32.mrb[29].mxu1 }
 0x15c   : > { %v867_v55 = vpop.f32.mrb[30].mxu0  ;;  %v995_v56 = vpop.f32.mrb[30].mxu1 }
 0x15d   : > { %2109 = vst [vmem:[%s2674_s14 + $0x30] sm:$0xff] %v1977_v49   ;;  %2125 = vst [vmem:[%s2674_s14 + $0xb0] sm:$0xff] %v2057_v50   ;;  %v1155_v57 = vadd.f32 %v2659_v19, %v1084_v51  ;;  %v1187_v58 = vadd.f32 %v2659_v19, %v1116_v52  ;;  %v1085_v59 = vmul.f32 %v2654_v17, %v867_v55  ;;  %v869_v61 = vpop.f32.mrb[31].mxu0  ;;  %v997_v62 = vpop.f32.mrb[31].mxu1 }
 0x15e   : > { %v1117_v60 = vmul.f32 %v2654_v17, %v995_v56 }
 0x15f   : > { %v1156_v63 = vadd.f32 %v2659_v19, %v1085_v59  ;;  %v1219_v1 = vmax.f32 %v1155_v57, 0.0  ;;  %v1251_v2 = vmax.f32 %v1187_v58, 0.0 }
 0x160   : > { %v1188_v0 = vadd.f32 %v2659_v19, %v1117_v60 }
 0x161   : > { %v1220_v3 = vmax.f32 %v1156_v63, 0.0 }
 0x162   : > { %v1252_v4 = vmax.f32 %v1188_v0, 0.0  ;;  %v872_v5 = vpop.f32.mrb[32].mxu0  ;;  %v1000_v6 = vpop.f32.mrb[32].mxu1 }
 0x163   : > { %v1982_v7 = vpack.c.bf16 %v1220_v3, %v1219_v1  ;;  %v1086_v9 = vmul.f32 %v2654_v17, %v872_v5  ;;  %v1118_v10 = vmul.f32 %v2654_v17, %v1000_v6  ;;  %v874_v11 = vpop.f32.mrb[33].mxu0  ;;  %v1002_v12 = vpop.f32.mrb[33].mxu1 }
 0x164   : > { %v2062_v8 = vpack.c.bf16 %v1252_v4, %v1251_v2  ;;  %v875_v13 = vpop.f32.mrb[34].mxu0  ;;  %v1003_v14 = vpop.f32.mrb[34].mxu1 }
 0x165   : > { %2110 = vst [vmem:[%s2674_s14 + $0x38] sm:$0xff] %v1982_v7   ;;  %v1157_v15 = vadd.f32 %v2659_v19, %v1086_v9  ;;  %v1189_v16 = vadd.f32 %v2659_v19, %v1118_v10  ;;  %v1087_v18 = vmul.f32 %v2654_v17, %v875_v13  ;;  %v1119_v20 = vmul.f32 %v2654_v17, %v1003_v14  ;;  %v877_v21 = vpop.f32.mrb[35].mxu0  ;;  %v1005_v22 = vpop.f32.mrb[35].mxu1 }
 0x166   : > { %2126 = vst [vmem:[%s2674_s14 + $0xb8] sm:$0xff] %v2062_v8  }
 0x167   : > { %v1158_v23 = vadd.f32 %v2659_v19, %v1087_v18  ;;  %v1190_v24 = vadd.f32 %v2659_v19, %v1119_v20  ;;  %v1221_v25 = vmax.f32 %v1157_v15, 0.0  ;;  %v1253_v26 = vmax.f32 %v1189_v16, 0.0 }
 0x169   : > { %v1222_v27 = vmax.f32 %v1158_v23, 0.0  ;;  %v1254_v28 = vmax.f32 %v1190_v24, 0.0 }
 0x16a   : > { %v880_v29 = vpop.f32.mrb[36].mxu0  ;;  %v1008_v30 = vpop.f32.mrb[36].mxu1 }
 0x16b   : > { %v1987_v31 = vpack.c.bf16 %v1222_v27, %v1221_v25  ;;  %v2067_v32 = vpack.c.bf16 %v1254_v28, %v1253_v26  ;;  %v1088_v33 = vmul.f32 %v2654_v17, %v880_v29  ;;  %v1120_v34 = vmul.f32 %v2654_v17, %v1008_v30  ;;  %v882_v35 = vpop.f32.mrb[37].mxu0  ;;  %v1010_v36 = vpop.f32.mrb[37].mxu1 }
 0x16c   : > { %v883_v37 = vpop.f32.mrb[38].mxu0  ;;  %v1011_v38 = vpop.f32.mrb[38].mxu1 }
 0x16d   : > { %2111 = vst [vmem:[%s2674_s14 + $0x40] sm:$0xff] %v1987_v31   ;;  %2127 = vst [vmem:[%s2674_s14 + $0xc0] sm:$0xff] %v2067_v32   ;;  %v1159_v39 = vadd.f32 %v2659_v19, %v1088_v33  ;;  %v1191_v40 = vadd.f32 %v2659_v19, %v1120_v34  ;;  %v1089_v41 = vmul.f32 %v2654_v17, %v883_v37  ;;  %v885_v43 = vpop.f32.mrb[39].mxu0  ;;  %v1013_v44 = vpop.f32.mrb[39].mxu1 }
 0x16e   : > { %v1121_v42 = vmul.f32 %v2654_v17, %v1011_v38 }
 0x16f   : > { %v1160_v45 = vadd.f32 %v2659_v19, %v1089_v41  ;;  %v1223_v47 = vmax.f32 %v1159_v39, 0.0  ;;  %v1255_v48 = vmax.f32 %v1191_v40, 0.0 }
 0x170   : > { %v1192_v46 = vadd.f32 %v2659_v19, %v1121_v42 }
 0x171   : > { %v1224_v49 = vmax.f32 %v1160_v45, 0.0 }
 0x172   : > { %v1256_v50 = vmax.f32 %v1192_v46, 0.0  ;;  %v888_v51 = vpop.f32.mrb[40].mxu0  ;;  %v1016_v52 = vpop.f32.mrb[40].mxu1 }
 0x173   : > { %v1992_v53 = vpack.c.bf16 %v1224_v49, %v1223_v47  ;;  %v1090_v55 = vmul.f32 %v2654_v17, %v888_v51  ;;  %v1122_v56 = vmul.f32 %v2654_v17, %v1016_v52  ;;  %v890_v57 = vpop.f32.mrb[41].mxu0  ;;  %v1018_v58 = vpop.f32.mrb[41].mxu1 }
 0x174   : > { %v2072_v54 = vpack.c.bf16 %v1256_v50, %v1255_v48  ;;  %v891_v59 = vpop.f32.mrb[42].mxu0  ;;  %v1019_v60 = vpop.f32.mrb[42].mxu1 }
 0x175   : > { %2112 = vst [vmem:[%s2674_s14 + $0x48] sm:$0xff] %v1992_v53   ;;  %v1161_v61 = vadd.f32 %v2659_v19, %v1090_v55  ;;  %v1193_v62 = vadd.f32 %v2659_v19, %v1122_v56  ;;  %v1091_v63 = vmul.f32 %v2654_v17, %v891_v59  ;;  %v1123_v0 = vmul.f32 %v2654_v17, %v1019_v60  ;;  %v893_v1 = vpop.f32.mrb[43].mxu0  ;;  %v1021_v2 = vpop.f32.mrb[43].mxu1 }
 0x176   : > { %2128 = vst [vmem:[%s2674_s14 + $0xc8] sm:$0xff] %v2072_v54  }
 0x177   : > { %v1162_v3 = vadd.f32 %v2659_v19, %v1091_v63  ;;  %v1194_v4 = vadd.f32 %v2659_v19, %v1123_v0  ;;  %v1225_v5 = vmax.f32 %v1161_v61, 0.0  ;;  %v1257_v6 = vmax.f32 %v1193_v62, 0.0 }
 0x179   : > { %v1226_v7 = vmax.f32 %v1162_v3, 0.0  ;;  %v1258_v8 = vmax.f32 %v1194_v4, 0.0 }
 0x17a   : > { %v896_v9 = vpop.f32.mrb[44].mxu0  ;;  %v1024_v10 = vpop.f32.mrb[44].mxu1 }
 0x17b   : > { %v1997_v11 = vpack.c.bf16 %v1226_v7, %v1225_v5  ;;  %v2077_v12 = vpack.c.bf16 %v1258_v8, %v1257_v6  ;;  %v1092_v13 = vmul.f32 %v2654_v17, %v896_v9  ;;  %v1124_v14 = vmul.f32 %v2654_v17, %v1024_v10  ;;  %v898_v15 = vpop.f32.mrb[45].mxu0  ;;  %v1026_v16 = vpop.f32.mrb[45].mxu1 }
 0x17c   : > { %v899_v18 = vpop.f32.mrb[46].mxu0  ;;  %v1027_v20 = vpop.f32.mrb[46].mxu1 }
 0x17d   : > { %2113 = vst [vmem:[%s2674_s14 + $0x50] sm:$0xff] %v1997_v11   ;;  %2129 = vst [vmem:[%s2674_s14 + $0xd0] sm:$0xff] %v2077_v12   ;;  %v1163_v21 = vadd.f32 %v2659_v19, %v1092_v13  ;;  %v1195_v22 = vadd.f32 %v2659_v19, %v1124_v14  ;;  %v1093_v23 = vmul.f32 %v2654_v17, %v899_v18  ;;  %v901_v25 = vpop.f32.mrb[47].mxu0  ;;  %v1029_v26 = vpop.f32.mrb[47].mxu1 }
 0x17e   : > { %v1125_v24 = vmul.f32 %v2654_v17, %v1027_v20 }
 0x17f   : > { %v1164_v27 = vadd.f32 %v2659_v19, %v1093_v23  ;;  %v1227_v29 = vmax.f32 %v1163_v21, 0.0  ;;  %v1259_v30 = vmax.f32 %v1195_v22, 0.0 }
 0x180   : > { %v1196_v28 = vadd.f32 %v2659_v19, %v1125_v24 }
 0x181   : > { %v1228_v31 = vmax.f32 %v1164_v27, 0.0 }
 0x182   : > { %v1260_v32 = vmax.f32 %v1196_v28, 0.0  ;;  %v904_v33 = vpop.f32.mrb[48].mxu0  ;;  %v1032_v34 = vpop.f32.mrb[48].mxu1 }
 0x183   : > { %v2002_v35 = vpack.c.bf16 %v1228_v31, %v1227_v29  ;;  %v1094_v37 = vmul.f32 %v2654_v17, %v904_v33  ;;  %v1126_v38 = vmul.f32 %v2654_v17, %v1032_v34  ;;  %v906_v39 = vpop.f32.mrb[49].mxu0  ;;  %v1034_v40 = vpop.f32.mrb[49].mxu1 }
 0x184   : > { %v2082_v36 = vpack.c.bf16 %v1260_v32, %v1259_v30  ;;  %v907_v41 = vpop.f32.mrb[50].mxu0  ;;  %v1035_v42 = vpop.f32.mrb[50].mxu1 }
 0x185   : > { %2114 = vst [vmem:[%s2674_s14 + $0x58] sm:$0xff] %v2002_v35   ;;  %v1165_v43 = vadd.f32 %v2659_v19, %v1094_v37  ;;  %v1197_v44 = vadd.f32 %v2659_v19, %v1126_v38  ;;  %v1095_v45 = vmul.f32 %v2654_v17, %v907_v41  ;;  %v1127_v46 = vmul.f32 %v2654_v17, %v1035_v42  ;;  %v909_v47 = vpop.f32.mrb[51].mxu0  ;;  %v1037_v48 = vpop.f32.mrb[51].mxu1 }
 0x186   : > { %2130 = vst [vmem:[%s2674_s14 + $0xd8] sm:$0xff] %v2082_v36  }
 0x187   : > { %v1166_v49 = vadd.f32 %v2659_v19, %v1095_v45  ;;  %v1198_v50 = vadd.f32 %v2659_v19, %v1127_v46  ;;  %v1229_v51 = vmax.f32 %v1165_v43, 0.0  ;;  %v1261_v52 = vmax.f32 %v1197_v44, 0.0 }
 0x189   : > { %v1230_v53 = vmax.f32 %v1166_v49, 0.0  ;;  %v1262_v54 = vmax.f32 %v1198_v50, 0.0 }
 0x18a   : > { %v912_v55 = vpop.f32.mrb[52].mxu0  ;;  %v1040_v56 = vpop.f32.mrb[52].mxu1 }
 0x18b   : > { %v2007_v57 = vpack.c.bf16 %v1230_v53, %v1229_v51  ;;  %v2087_v58 = vpack.c.bf16 %v1262_v54, %v1261_v52  ;;  %v1096_v59 = vmul.f32 %v2654_v17, %v912_v55  ;;  %v1128_v60 = vmul.f32 %v2654_v17, %v1040_v56  ;;  %v914_v61 = vpop.f32.mrb[53].mxu0  ;;  %v1042_v62 = vpop.f32.mrb[53].mxu1 }
 0x18c   : > { %v915_v63 = vpop.f32.mrb[54].mxu0  ;;  %v1043_v0 = vpop.f32.mrb[54].mxu1 }
 0x18d   : > { %2115 = vst [vmem:[%s2674_s14 + $0x60] sm:$0xff] %v2007_v57   ;;  %2131 = vst [vmem:[%s2674_s14 + $0xe0] sm:$0xff] %v2087_v58   ;;  %v1167_v1 = vadd.f32 %v2659_v19, %v1096_v59  ;;  %v1199_v2 = vadd.f32 %v2659_v19, %v1128_v60  ;;  %v1097_v3 = vmul.f32 %v2654_v17, %v915_v63  ;;  %v917_v5 = vpop.f32.mrb[55].mxu0  ;;  %v1045_v6 = vpop.f32.mrb[55].mxu1 }
 0x18e   : > { %v1129_v4 = vmul.f32 %v2654_v17, %v1043_v0 }
 0x18f   : > { %v1168_v7 = vadd.f32 %v2659_v19, %v1097_v3  ;;  %v1231_v9 = vmax.f32 %v1167_v1, 0.0  ;;  %v1263_v10 = vmax.f32 %v1199_v2, 0.0 }
 0x190   : > { %v1200_v8 = vadd.f32 %v2659_v19, %v1129_v4 }
 0x191   : > { %v1232_v11 = vmax.f32 %v1168_v7, 0.0 }
 0x192   : > { %v1264_v12 = vmax.f32 %v1200_v8, 0.0  ;;  %v920_v13 = vpop.f32.mrb[56].mxu0  ;;  %v1048_v14 = vpop.f32.mrb[56].mxu1 }
 0x193   : > { %v2012_v15 = vpack.c.bf16 %v1232_v11, %v1231_v9  ;;  %v1098_v18 = vmul.f32 %v2654_v17, %v920_v13  ;;  %v1130_v20 = vmul.f32 %v2654_v17, %v1048_v14  ;;  %v922_v21 = vpop.f32.mrb[57].mxu0  ;;  %v1050_v22 = vpop.f32.mrb[57].mxu1 }
 0x194   : > { %v2092_v16 = vpack.c.bf16 %v1264_v12, %v1263_v10  ;;  %v923_v23 = vpop.f32.mrb[58].mxu0  ;;  %v1051_v24 = vpop.f32.mrb[58].mxu1 }
 0x195   : > { %2116 = vst [vmem:[%s2674_s14 + $0x68] sm:$0xff] %v2012_v15   ;;  %v1169_v25 = vadd.f32 %v2659_v19, %v1098_v18  ;;  %v1201_v26 = vadd.f32 %v2659_v19, %v1130_v20  ;;  %v1099_v27 = vmul.f32 %v2654_v17, %v923_v23  ;;  %v1131_v28 = vmul.f32 %v2654_v17, %v1051_v24  ;;  %v925_v29 = vpop.f32.mrb[59].mxu0  ;;  %v1053_v30 = vpop.f32.mrb[59].mxu1 }
 0x196   : > { %2132 = vst [vmem:[%s2674_s14 + $0xe8] sm:$0xff] %v2092_v16  }
 0x197   : > { %v1170_v31 = vadd.f32 %v2659_v19, %v1099_v27  ;;  %v1202_v32 = vadd.f32 %v2659_v19, %v1131_v28  ;;  %v1233_v33 = vmax.f32 %v1169_v25, 0.0  ;;  %v1265_v34 = vmax.f32 %v1201_v26, 0.0 }
 0x199   : > { %v1234_v35 = vmax.f32 %v1170_v31, 0.0  ;;  %v1266_v36 = vmax.f32 %v1202_v32, 0.0 }
 0x19a   : > { %v928_v37 = vpop.f32.mrb[60].mxu0  ;;  %v1056_v38 = vpop.f32.mrb[60].mxu1 }
 0x19b   : > { %v2017_v39 = vpack.c.bf16 %v1234_v35, %v1233_v33  ;;  %v2097_v40 = vpack.c.bf16 %v1266_v36, %v1265_v34  ;;  %v1100_v41 = vmul.f32 %v2654_v17, %v928_v37  ;;  %v1132_v42 = vmul.f32 %v2654_v17, %v1056_v38  ;;  %v930_v43 = vpop.f32.mrb[61].mxu0  ;;  %v1058_v44 = vpop.f32.mrb[61].mxu1 }
 0x19c   : > { %v931_v45 = vpop.f32.mrb[62].mxu0  ;;  %v1059_v46 = vpop.f32.mrb[62].mxu1 }
 0x19d   : > { %2117 = vst [vmem:[%s2674_s14 + $0x70] sm:$0xff] %v2017_v39   ;;  %2133 = vst [vmem:[%s2674_s14 + $0xf0] sm:$0xff] %v2097_v40   ;;  %v1171_v47 = vadd.f32 %v2659_v19, %v1100_v41  ;;  %v1203_v48 = vadd.f32 %v2659_v19, %v1132_v42  ;;  %v1101_v49 = vmul.f32 %v2654_v17, %v931_v45  ;;  %v933_v51 = vpop.f32.mrb[63].mxu0  ;;  %v1061_v52 = vpop.f32.mrb[63].mxu1 }
 0x19e   : > { %v1133_v50 = vmul.f32 %v2654_v17, %v1059_v46 }
 0x19f   : > { %v1172_v53 = vadd.f32 %v2659_v19, %v1101_v49  ;;  %v1235_v55 = vmax.f32 %v1171_v47, 0.0  ;;  %v1267_v56 = vmax.f32 %v1203_v48, 0.0 }
 0x1a0   : > { %v1204_v54 = vadd.f32 %v2659_v19, %v1133_v50 }
 0x1a1   : > { %v1236_v57 = vmax.f32 %v1172_v53, 0.0 }
 0x1a2   : > { %v1268_v58 = vmax.f32 %v1204_v54, 0.0 }
 0x1a3   : > { %v2022_v17 = vpack.c.bf16 %v1236_v57, %v1235_v55 }
 0x1a4   : > { %v2102_v59 = vpack.c.bf16 %v1268_v58, %v1267_v56 }
 0x1a5   : > { %2118 = vst [vmem:[%s2674_s14 + $0x78] sm:$0xff] %v2022_v17  }
 0x1a6   : > { %2134 = vst [vmem:[%s2674_s14 + $0xf8] sm:$0xff] %v2102_v59  }
 0x1a7   : > { %2350 = shalt.err (!%p2347_p5)
}
 0x1a8   : > { %s2351_s9 = scalar_lea.hbm %s2829_s30, 4096  ;;  %s2355_s12 = scalar_lea.hbm %s2887_s4, 16384 }
 0x1a9   : > { %p2352_p6 = scmp.ne.s32.totalorder %s2829_s30, %s2351_s9  ;;  %p2356_p10 = scmp.lt.u32.totalorder %s2829_s30, %s2887_s4 }
 0x1aa   : > { %p2357_p11 = scmp.lt.u32.totalorder %s2355_s12, %s2351_s9  ;;  %p2359_p13 = scmp.lt.u32.totalorder %s2351_s9, %s2829_s30 }
 0x1ab   : > { %p2353_p7 = pnand %p2352_p6, %p2486_p4 }
 0x1ac   : > { %p2358_p12 = por %p2357_p11, %p2356_p10 }
 0x1ad   : > { %p2354_p9 = pneg %p2353_p7 }
 0x1ae   : > { %p2360_p0 = por %p2359_p13, %p2358_p12 }
 0x1b0   : > { %p2361_p1 = pnand %p2360_p0, %p2354_p9 }
 0x1b2   : > { %2364 = shalt.err (!%p2361_p1)
}
 0x1b3   : > { %s2419_s14 = smov 64   ;;  %s2420_s21 = smov 4  }
 0x1b4   : > { %2167 = dma.vmem_to_hbm [thread:$0]  (%p2486_p4), %s2831_s22, 4096, %s2829_s30, %s2837_s18, %s2419_s14, %s2419_s14, %s2420_s21  }
 0x1b5 PF: > { %p2173_p2 = scmp.ge.s32.totalorder %s2415_s20, 2  ;;  %s1619_s26 = sand.u32 1, %s2395_s15  }
 0x1b6   : > { %s1620_s29 = scalar_lea.sflag [#allocation3], %s1619_s26 }
 0x1b7   : > { %p2170_p3 = pnand %p2173_p2, %p2493_p8 }
 0x1b9   : > { %2390 = dma.done.wait (!%p2170_p3), %s1620_s29, 4096  }
 0x1ba   : > { %2392 = vsyncadd (!%p2170_p3), %s1620_s29, 4294963200  ;;  %s17_s20 = sadd.s32 1, %s2415_s20   ;;  %s2890_s15 = smov %s2399_s16 }
 0x1bb   : > { %p14_p5 = scmp.ge.s32.totalorder %s17_s20, 6   ;;  %s2891_s16 = smov %s2403_s17 }
 0x1bc   : > { %s2892_s17 = smov %s2499_s28  ;;  %s2893_s18 = smov %s2411_s19 }
 0x1bd   : > { %s2894_s19 = smov %s2896_s23  ;;  %16 = sbr.rel (!%p14_p5) target bundleno = 4 (0x4), region = 80 }
 0x1c4   :  { %1625 = vsyncpa [#allocation3], 1 }
 0x1c5   :  { %1627 = vsyncpa [#allocation3 + $0x1], 1 }

</bundles_post_ra>
